<compile_context>
chip_gen: v5e
topology: v5e:2x2
jax: 0.10.0
libtpu: 0.0.40
codegen_flags: <defaults>
</compile_context>

<pallas_src>
import jax
import jax.numpy as jnp
from jax import lax
from jax.experimental import pallas as pl
from jax.experimental.pallas import tpu as pltpu

BN_EPS = 1e-5


# ----------------------------------------------------------------------------
# VMEM sizing helpers (generation aware)
# ----------------------------------------------------------------------------
def _vmem_capacity_bytes():
    try:
        info = pltpu.get_tpu_info()
        cap = getattr(info, "vmem_capacity_bytes", None)
        if cap:
            return int(cap)
    except Exception:
        pass
    return 64 * 1024 * 1024          # v7x-safe fallback


def _padded_bytes(shape, itemsize=4):
    """VMEM footprint of a 2-D f32 block after (8, 128) tiling/padding."""
    rows = -(-shape[-2] // 8) * 8 if len(shape) >= 2 else 8
    cols = -(-shape[-1] // 128) * 128
    lead = 1
    for d in shape[:-2]:
        lead *= int(d)
    return lead * rows * cols * itemsize


# ----------------------------------------------------------------------------
# Fused kernel
# ----------------------------------------------------------------------------
def _make_fused_kernel(*, has_points1, s, sp, d2, tile_n, num_layers):
    """3-NN interpolation + (implicit concat) + folded-BN MLP stack."""

    def kernel(*refs):
        i = 0
        if s > 1:
            x1_ref, x2_ref = refs[i], refs[i + 1]
            i += 2
        pts2_ref = refs[i]; i += 1
        if has_points1:
            pts1_ref = refs[i]; i += 1
        layer_refs = refs[i:-1]
        out_ref = refs[-1]

        # ---------------- 3-NN inverse-distance interpolation ---------------
        if s == 1:
            # torch: points2.repeat(1, N, 1)
            interp = jnp.broadcast_to(pts2_ref[0], (d2, tile_n))
        else:
            x1a = x1_ref[0]          # (C+1, tile_n): coord rows + ones row
            x2a = x2_ref[0]          # (Sp, C+1):   [-2*coords | sq2] (inf-padded)
            p2 = pts2_ref[0]         # (D2, Sp)     (zero-padded)

            # |xyz1|^2 per column: pure-VPU sum over the (few) coord rows.
            c = x1a.shape[0] - 1
            sq1 = x1a[0:1] * x1a[0:1]
            for cc in range(1, c):
                sq1 = sq1 + x1a[cc:cc + 1] * x1a[cc:cc + 1]

            # d[s, n] = sq2[s] - 2<xyz2[s], xyz1[n]> + sq1[n]
            # (sq2 and the -2 are folded into x2a on the host)
            cross = jnp.dot(x2a, x1a, preferred_element_type=jnp.float32)
            d = jnp.maximum(cross + sq1, 0.0)            # clamp fp cancellation

            row_idx = lax.broadcasted_iota(jnp.int32, (sp, 1), 0)   # (Sp, 1)

            def _argmin_fold(vals):
                """Stable (first-occurrence) min+argmin over axis 0 as a
                log2(Sp) pairwise fold on the VPU (no XLU reductions)."""
                h = sp // 2
                lo, hi = vals[:h], vals[h:]
                take_lo = lo <= hi                       # lower half = lower index
                val = jnp.where(take_lo, lo, hi)
                base = lax.broadcasted_iota(jnp.int32, (h, 1), 0)
                idx = jnp.where(take_lo, base, base + h)
                while h > 1:
                    h //= 2
                    vlo, vhi = val[:h], val[h:]
                    ilo, ihi = idx[:h], idx[h:]
                    take_lo = (vlo < vhi) | ((vlo == vhi) & (ilo <= ihi))
                    val = jnp.where(take_lo, vlo, vhi)
                    idx = jnp.where(take_lo, ilo, ihi)
                return val, idx                          # (1, tile_n) each

            w_mat = jnp.zeros((sp, tile_n), jnp.float32)
            norm = jnp.zeros((1, tile_n), jnp.float32)
            d_work = d
            # TODO(synk): for very large S (>=512) chunk the source set with a
            # running top-3 carry instead of materialising the full (Sp, n)
            # distance matrix.
            for _ in range(3):                           # 3-NN, statically unrolled
                m, sel = _argmin_fold(d_work)
                onehot = row_idx == sel                  # (Sp, tile_n) VPU compare
                recip = pl.reciprocal(m + 1e-8)          # (1, tile_n)
                w_mat = w_mat + onehot.astype(jnp.float32) * recip
                norm = norm + recip
                d_work = jnp.where(onehot, jnp.float32(jnp.inf), d_work)

            # gather-by-matmul, normalised AFTER the matmul with a reciprocal-mul
            interp = jnp.dot(p2, w_mat, preferred_element_type=jnp.float32)
            interp = interp * pl.reciprocal(norm)        # (D2, tile_n)

        # ---------------- MLP stack: Conv1d(k=1) + folded BN + ReLU ----------
        if num_layers == 0:
            out_ref[0] = (jnp.concatenate([pts1_ref[0], interp], axis=0)
                          if has_points1 else interp)
            return

        j = 0
        if has_points1:
            w0a, w0b, sh = layer_refs[j][...], layer_refs[j + 1][...], layer_refs[j + 2][...]
            j += 3
            # concat([points1, interp]) folded into a split first-layer weight
            x = (jnp.dot(w0a, pts1_ref[0], preferred_element_type=jnp.float32)
                 + jnp.dot(w0b, interp, preferred_element_type=jnp.float32) + sh)
        else:
            w0, sh = layer_refs[j][...], layer_refs[j + 1][...]
            j += 2
            x = jnp.dot(w0, interp, preferred_element_type=jnp.float32) + sh
        x = jnp.maximum(x, 0.0)

        for _ in range(1, num_layers):
            w, sh = layer_refs[j][...], layer_refs[j + 1][...]
            j += 2
            x = jnp.maximum(
                jnp.dot(w, x, preferred_element_type=jnp.float32) + sh, 0.0)

        out_ref[0] = x                                   # (C_last, tile_n), lane-dense

    return kernel


# ----------------------------------------------------------------------------
# Module wrapper
# ----------------------------------------------------------------------------
def init_params(key, in_channel, mlp):
    """Deterministic Conv1d / BatchNorm1d parameters (BN in eval mode)."""
    params = []
    last = in_channel
    for i, out_ch in enumerate(mlp):
        kw, kb, kg, kbe, km, kv = jax.random.split(jax.random.fold_in(key, i), 6)
        w = jax.random.normal(kw, (out_ch, last, 1), jnp.float32) * 0.1
        b = jax.random.normal(kb, (out_ch,), jnp.float32) * 0.1
        gamma = 1.0 + 0.1 * jax.random.normal(kg, (out_ch,), jnp.float32)
        beta = 0.1 * jax.random.normal(kbe, (out_ch,), jnp.float32)
        run_mean = 0.1 * jax.random.normal(km, (out_ch,), jnp.float32)
        run_var = 1.0 + 0.1 * jax.random.uniform(kv, (out_ch,), jnp.float32)
        params.append(dict(w=w, b=b, gamma=gamma, beta=beta,
                           mean=run_mean, var=run_var))
        last = out_ch
    return params


def pointnet_fp_forward(xyz1, xyz2, points1, points2, params):
    """Inputs in PyTorch layout: xyz1 [B,C,N], xyz2 [B,C,S], points1 [B,D1,N]
    (or None), points2 [B,D2,S].  Returns [B, D', N] (BN in eval mode)."""
    xyz1 = xyz1.astype(jnp.float32)
    xyz2 = xyz2.astype(jnp.float32)
    pts2 = points2.astype(jnp.float32)
    B, C, N = xyz1.shape
    S = xyz2.shape[2]
    D2 = pts2.shape[1]
    has_points1 = points1 is not None
    D1 = points1.shape[1] if has_points1 else 0
    num_layers = len(params)
    c_last = params[-1]["w"].shape[0] if num_layers else (D1 + D2)

    # ---- fold BN (eval) into the conv weights (scale) + a per-channel shift
    layer_arrays, widths = [], []
    for li, p in enumerate(params):
        bn_scale = (p["gamma"] / jnp.sqrt(p["var"] + BN_EPS)).astype(jnp.float32)
        w2d = p["w"][:, :, 0].astype(jnp.float32) * bn_scale[:, None]     # (Cout, Cin)
        shift = ((p["beta"] + (p["b"] - p["mean"]) * bn_scale)[:, None]
                 .astype(jnp.float32))                                    # (Cout, 1)
        if li == 0 and has_points1:
            layer_arrays += [w2d[:, :D1], w2d[:, D1:], shift]
        else:
            layer_arrays += [w2d, shift]
        widths.append(w2d.shape[0])

    # ---- host-side prep of the distance operands (S padded to a power of 2)
    if S > 1:
        SP = max(2, 1 << (S - 1).bit_length())
        sq2 = jnp.sum(xyz2 * xyz2, axis=1, keepdims=True)                 # [B, 1, S]
        x2aug = jnp.transpose(jnp.concatenate([-2.0 * xyz2, sq2], axis=1),
                              (0, 2, 1))                                  # [B, S, C+1]
        if SP > S:
            pad = jnp.concatenate(
                [jnp.zeros((B, SP - S, C), jnp.float32),
                 jnp.full((B, SP - S, 1), jnp.inf, jnp.float32)], axis=2)
            x2aug = jnp.concatenate([x2aug, pad], axis=1)                 # pad rows: d = inf
            pts2_p = jnp.concatenate(
                [pts2, jnp.zeros((B, D2, SP - S), jnp.float32)], axis=2)
        else:
            pts2_p = pts2
        x1aug = jnp.concatenate([xyz1, jnp.ones((B, 1, N), jnp.float32)], axis=1)
    else:
        SP = 1
        pts2_p = pts2

    # ---- generation-aware tile choice (accounts for double buffering + weights)
    max_c = max([D1 + D2] + widths) if (widths or (D1 + D2)) else 1
    cap = _vmem_capacity_bytes()
    budget = int(cap * 0.60)
    vmem_limit = int(cap * 0.80)

    fixed = 0
    for arr in layer_arrays:                         # grid-invariant, still 2x buffered
        fixed += 2 * _padded_bytes(arr.shape)
    if S > 1:
        fixed += 2 * _padded_bytes((SP, C + 1)) + 2 * _padded_bytes((D2, SP))
    else:
        fixed += 2 * _padded_bytes((D2, 1))
    # TODO(synk): pipeline_mode=pl.Buffered(1) on the grid-invariant blocks would
    # halve `fixed`; left out pending API verification on the target jax version.

    c_xyz = (C + 1) if S > 1 else 0
    per_n = 4 * (2 * (c_xyz + D1 + c_last)           # double-buffered per-tile blocks
                 + 6 * SP                            # dist / one-hot / fold temporaries
                 + 3 * max_c + D2 + 16)              # activations + interp + vectors
    tile_n = N
    for t in (4096, 2048, 1024, 512, 256, 128):
        if N % t == 0 and fixed + per_n * t <= budget:
            tile_n = t
            break
    # TODO(synk): N not divisible by 128 and too large for one tile would need a
    # masked tail tile; typical PointNet N (powers of two) is covered above.

    # v7x megacore: keep both TensorCores busy (>= 2 parallel grid steps).
    while (B * (N // tile_n) < 2 and tile_n % 2 == 0
           and (tile_n // 2) >= 128 and N % (tile_n // 2) == 0):
        tile_n //= 2

    grid = (B, N // tile_n)
    in_specs, operands = [], []
    if S > 1:
        in_specs += [pl.BlockSpec((1, C + 1, tile_n), lambda b, n: (b, 0, n)),
                     pl.BlockSpec((1, SP, C + 1), lambda b, n: (b, 0, 0))]
        operands += [x1aug, x2aug]
    in_specs.append(pl.BlockSpec((1, D2, SP), lambda b, n: (b, 0, 0)))
    operands.append(pts2_p)
    if has_points1:
        in_specs.append(pl.BlockSpec((1, D1, tile_n), lambda b, n: (b, 0, n)))
        operands.append(points1.astype(jnp.float32))
    for arr in layer_arrays:                         # weights / shifts: VMEM-resident
        in_specs.append(pl.BlockSpec(arr.shape, lambda b, n: (0, 0)))
        operands.append(arr)

    kernel = _make_fused_kernel(has_points1=has_points1, s=S, sp=SP, d2=D2,
                                tile_n=tile_n, num_layers=num_layers)
    return pl.pallas_call(
        kernel,
        out_shape=jax.ShapeDtypeStruct((B, c_last, N), jnp.float32),
        grid=grid,
        in_specs=in_specs,
        out_specs=pl.BlockSpec((1, c_last, tile_n), lambda b, n: (b, 0, n)),
        compiler_params=pltpu.CompilerParams(
            dimension_semantics=("parallel", "parallel"),
            vmem_limit_bytes=vmem_limit),
    )(*operands)


# ----------------------------------------------------------------------------
# Pure-JAX reference (mirrors the torch module, BN in eval mode)
# ----------------------------------------------------------------------------
def reference_forward(xyz1, xyz2, points1, points2, params):
    x1 = jnp.transpose(xyz1, (0, 2, 1)).astype(jnp.float32)
    x2 = jnp.transpose(xyz2, (0, 2, 1)).astype(jnp.float32)
    p2 = jnp.transpose(points2, (0, 2, 1)).astype(jnp.float32)
    B, N, _ = x1.shape
    S = x2.shape[1]
    if S == 1:
        interp = jnp.tile(p2, (1, N, 1))
    else:
        dists = (jnp.sum(x1 ** 2, -1)[:, :, None]
                 + jnp.sum(x2 ** 2, -1)[:, None, :]
                 - 2.0 * jnp.einsum("bnc,bmc->bnm", x1, x2))
        dists = jnp.maximum(dists, 0.0)   # matches kernel clamp (degenerate only)
        idx = jnp.argsort(dists, axis=-1, stable=True)[:, :, :3]
        d3 = jnp.take_along_axis(dists, idx, axis=-1)
        recip = 1.0 / (d3 + 1e-8)
        w = recip / jnp.sum(recip, axis=-1, keepdims=True)
        gathered = jax.vmap(lambda pts, ind: pts[ind])(p2, idx)       # [B,N,3,D2]
        interp = jnp.sum(gathered * w[..., None], axis=2)
    if points1 is not None:
        new_points = jnp.concatenate(
            [jnp.transpose(points1, (0, 2, 1)).astype(jnp.float32), interp], axis=-1)
    else:
        new_points = interp
    x = new_points
    for p in params:
        y = jnp.einsum("bnc,oc->bno", x, p["w"][:, :, 0]) + p["b"]
        y = (y - p["mean"]) / jnp.sqrt(p["var"] + BN_EPS) * p["gamma"] + p["beta"]
        x = jnp.maximum(y, 0.0)
    return jnp.transpose(x, (0, 2, 1))


if __name__ == "__main__":
    key = jax.random.PRNGKey(0)
    B, C, N, S = 2, 3, 16, 8          # coords are 3-D points
    D1, D2 = 4, 8                     # points1 / points2 feature channels
    mlp = [32, 16]

    k1, k2, k3, k4, kp, kp2 = jax.random.split(key, 6)
    xyz1 = jax.random.normal(k1, (B, C, N), jnp.float32)
    xyz2 = jax.random.normal(k2, (B, C, S), jnp.float32)
    points1 = jax.random.normal(k3, (B, D1, N), jnp.float32)
    points2 = jax.random.normal(k4, (B, D2, S), jnp.float32)

    # main path: points1 present, S > 1
    params = init_params(kp, D1 + D2, mlp)
    out = jax.block_until_ready(
        pointnet_fp_forward(xyz1, xyz2, points1, points2, params))
    ref = reference_forward(xyz1, xyz2, points1, points2, params)
    assert out.shape == (B, mlp[-1], N), out.shape
    assert jnp.allclose(out, ref, atol=1e-4, rtol=1e-4), float(
        jnp.max(jnp.abs(out - ref)))

    # points1 is None path (first layer takes only interpolated features)
    params_np1 = init_params(kp2, D2, mlp)
    out2 = jax.block_until_ready(
        pointnet_fp_forward(xyz1, xyz2, None, points2, params_np1))
    ref2 = reference_forward(xyz1, xyz2, None, points2, params_np1)
    assert jnp.allclose(out2, ref2, atol=1e-4, rtol=1e-4), float(
        jnp.max(jnp.abs(out2 - ref2)))

    # S == 1 path (interpolation degenerates to a broadcast of points2)
    out3 = jax.block_until_ready(
        pointnet_fp_forward(xyz1, xyz2[:, :, :1], points1, points2[:, :, :1], params))
    ref3 = reference_forward(xyz1, xyz2[:, :, :1], points1, points2[:, :, :1], params)
    assert jnp.allclose(out3, ref3, atol=1e-4, rtol=1e-4), float(
        jnp.max(jnp.abs(out3 - ref3)))

    print("KERNEL_OK")
</pallas_src>

<mosaic_0001>
module attributes {stable_mosaic.version = 11 : i64} {
  func.func @kernel(%arg0: i32, %arg1: i32, %arg2: memref<1x4x16xf32, #tpu.memory_space<vmem>>, %arg3: memref<1x8x4xf32, #tpu.memory_space<vmem>>, %arg4: memref<1x8x8xf32, #tpu.memory_space<vmem>>, %arg5: memref<1x4x16xf32, #tpu.memory_space<vmem>>, %arg6: memref<32x4xf32, #tpu.memory_space<vmem>>, %arg7: memref<32x8xf32, #tpu.memory_space<vmem>>, %arg8: memref<32x1xf32, #tpu.memory_space<vmem>>, %arg9: memref<16x32xf32, #tpu.memory_space<vmem>>, %arg10: memref<16x1xf32, #tpu.memory_space<vmem>>, %arg11: memref<1x16x16xf32, #tpu.memory_space<vmem>>) attributes {dimension_semantics = [#tpu.dimension_semantics<parallel>, #tpu.dimension_semantics<parallel>], iteration_bounds = array<i64: 2, 1>, scalar_prefetch = 0 : i64, scratch_operands = 0 : i64, tpu.core_type = #tpu.core_type<tc>, window_params = [{transform_indices = @transform_0, window_bounds = array<i64: 1, 4, 16>}, {transform_indices = @transform_1, window_bounds = array<i64: 1, 8, 4>}, {transform_indices = @transform_2, window_bounds = array<i64: 1, 8, 8>}, {transform_indices = @transform_3, window_bounds = array<i64: 1, 4, 16>}, {pipeline_mode = #tpu.pipeline_mode<synchronous>, transform_indices = @transform_4, window_bounds = array<i64: 32, 4>}, {pipeline_mode = #tpu.pipeline_mode<synchronous>, transform_indices = @transform_5, window_bounds = array<i64: 32, 8>}, {pipeline_mode = #tpu.pipeline_mode<synchronous>, transform_indices = @transform_6, window_bounds = array<i64: 32, 1>}, {pipeline_mode = #tpu.pipeline_mode<synchronous>, transform_indices = @transform_7, window_bounds = array<i64: 16, 32>}, {pipeline_mode = #tpu.pipeline_mode<synchronous>, transform_indices = @transform_8, window_bounds = array<i64: 16, 1>}, {transform_indices = @transform_9, window_bounds = array<i64: 1, 16, 16>}]} {
    %c0 = arith.constant 0 : index
    %c0_0 = arith.constant 0 : index
    %c0_1 = arith.constant 0 : index
    %0 = vector.load %arg2[%c0, %c0_0, %c0_1] : memref<1x4x16xf32, #tpu.memory_space<vmem>>, vector<1x4x16xf32>
    %1 = vector.shape_cast %0 : vector<1x4x16xf32> to vector<4x16xf32>
    %c0_2 = arith.constant 0 : index
    %c0_3 = arith.constant 0 : index
    %c0_4 = arith.constant 0 : index
    %2 = vector.load %arg3[%c0_2, %c0_3, %c0_4] : memref<1x8x4xf32, #tpu.memory_space<vmem>>, vector<1x8x4xf32>
    %3 = vector.shape_cast %2 : vector<1x8x4xf32> to vector<8x4xf32>
    %c0_5 = arith.constant 0 : index
    %c0_6 = arith.constant 0 : index
    %c0_7 = arith.constant 0 : index
    %4 = vector.load %arg4[%c0_5, %c0_6, %c0_7] : memref<1x8x8xf32, #tpu.memory_space<vmem>>, vector<1x8x8xf32>
    %5 = vector.shape_cast %4 : vector<1x8x8xf32> to vector<8x8xf32>
    %6 = vector.extract_strided_slice %1 {offsets = [0, 0], sizes = [1, 16], strides = [1, 1]} : vector<4x16xf32> to vector<1x16xf32>
    %7 = vector.extract_strided_slice %1 {offsets = [0, 0], sizes = [1, 16], strides = [1, 1]} : vector<4x16xf32> to vector<1x16xf32>
    %8 = arith.mulf %6, %7 : vector<1x16xf32>
    %9 = vector.extract_strided_slice %1 {offsets = [1, 0], sizes = [1, 16], strides = [1, 1]} : vector<4x16xf32> to vector<1x16xf32>
    %10 = vector.extract_strided_slice %1 {offsets = [1, 0], sizes = [1, 16], strides = [1, 1]} : vector<4x16xf32> to vector<1x16xf32>
    %11 = arith.mulf %9, %10 : vector<1x16xf32>
    %12 = arith.addf %8, %11 : vector<1x16xf32>
    %13 = vector.extract_strided_slice %1 {offsets = [2, 0], sizes = [1, 16], strides = [1, 1]} : vector<4x16xf32> to vector<1x16xf32>
    %14 = vector.extract_strided_slice %1 {offsets = [2, 0], sizes = [1, 16], strides = [1, 1]} : vector<4x16xf32> to vector<1x16xf32>
    %15 = arith.mulf %13, %14 : vector<1x16xf32>
    %16 = arith.addf %12, %15 : vector<1x16xf32>
    %cst = arith.constant dense<0.000000e+00> : vector<8x16xf32>
    %17 = tpu.matmul %3, %1, %cst {dimension_numbers = #tpu.dot_dimension_numbers<[1], [0], [0], [1], [0, 0, 1, 1], [], []>} : vector<8x4xf32>, vector<4x16xf32>, vector<8x16xf32> -> vector<8x16xf32>
    %18 = vector.broadcast %16 : vector<1x16xf32> to vector<8x16xf32>
    %19 = arith.addf %17, %18 : vector<8x16xf32>
    %cst_8 = arith.constant 0.000000e+00 : f32
    %20 = vector.broadcast %cst_8 : f32 to vector<8x16xf32>
    %21 = arith.maximumf %19, %20 : vector<8x16xf32>
    %22 = tpu.iota {dimensions = array<i32: 0>} : vector<8x1xi32>
    %cst_9 = arith.constant 0.000000e+00 : f32
    %23 = vector.broadcast %cst_9 : f32 to vector<8x16xf32>
    %cst_10 = arith.constant 0.000000e+00 : f32
    %24 = vector.broadcast %cst_10 : f32 to vector<1x16xf32>
    %25 = vector.extract_strided_slice %21 {offsets = [0, 0], sizes = [4, 16], strides = [1, 1]} : vector<8x16xf32> to vector<4x16xf32>
    %26 = vector.extract_strided_slice %21 {offsets = [4, 0], sizes = [4, 16], strides = [1, 1]} : vector<8x16xf32> to vector<4x16xf32>
    %27 = arith.cmpf ole, %25, %26 : vector<4x16xf32>
    %28 = arith.select %27, %25, %26 : vector<4x16xi1>, vector<4x16xf32>
    %29 = tpu.iota {dimensions = array<i32: 0>} : vector<4x1xi32>
    %c4_i32 = arith.constant 4 : i32
    %30 = vector.broadcast %c4_i32 : i32 to vector<4x1xi32>
    %31 = arith.addi %29, %30 : vector<4x1xi32>
    %32 = vector.shape_cast %29 : vector<4x1xi32> to vector<4x1xi32>
    %33 = vector.broadcast %32 : vector<4x1xi32> to vector<4x16xi32>
    %34 = vector.shape_cast %31 : vector<4x1xi32> to vector<4x1xi32>
    %35 = vector.broadcast %34 : vector<4x1xi32> to vector<4x16xi32>
    %36 = arith.select %27, %33, %35 : vector<4x16xi1>, vector<4x16xi32>
    %37 = vector.extract_strided_slice %28 {offsets = [0, 0], sizes = [2, 16], strides = [1, 1]} : vector<4x16xf32> to vector<2x16xf32>
    %38 = vector.extract_strided_slice %28 {offsets = [2, 0], sizes = [2, 16], strides = [1, 1]} : vector<4x16xf32> to vector<2x16xf32>
    %39 = vector.extract_strided_slice %36 {offsets = [0, 0], sizes = [2, 16], strides = [1, 1]} : vector<4x16xi32> to vector<2x16xi32>
    %40 = vector.extract_strided_slice %36 {offsets = [2, 0], sizes = [2, 16], strides = [1, 1]} : vector<4x16xi32> to vector<2x16xi32>
    %41 = arith.cmpf olt, %37, %38 : vector<2x16xf32>
    %42 = arith.cmpf oeq, %37, %38 : vector<2x16xf32>
    %43 = arith.cmpi sle, %39, %40 : vector<2x16xi32>
    %44 = arith.andi %42, %43 : vector<2x16xi1>
    %45 = arith.ori %41, %44 : vector<2x16xi1>
    %46 = arith.select %45, %37, %38 : vector<2x16xi1>, vector<2x16xf32>
    %47 = arith.select %45, %39, %40 : vector<2x16xi1>, vector<2x16xi32>
    %48 = vector.extract_strided_slice %46 {offsets = [0, 0], sizes = [1, 16], strides = [1, 1]} : vector<2x16xf32> to vector<1x16xf32>
    %49 = vector.extract_strided_slice %46 {offsets = [1, 0], sizes = [1, 16], strides = [1, 1]} : vector<2x16xf32> to vector<1x16xf32>
    %50 = vector.extract_strided_slice %47 {offsets = [0, 0], sizes = [1, 16], strides = [1, 1]} : vector<2x16xi32> to vector<1x16xi32>
    %51 = vector.extract_strided_slice %47 {offsets = [1, 0], sizes = [1, 16], strides = [1, 1]} : vector<2x16xi32> to vector<1x16xi32>
    %52 = arith.cmpf olt, %48, %49 : vector<1x16xf32>
    %53 = arith.cmpf oeq, %48, %49 : vector<1x16xf32>
    %54 = arith.cmpi sle, %50, %51 : vector<1x16xi32>
    %55 = arith.andi %53, %54 : vector<1x16xi1>
    %56 = arith.ori %52, %55 : vector<1x16xi1>
    %57 = arith.select %56, %48, %49 : vector<1x16xi1>, vector<1x16xf32>
    %58 = arith.select %56, %50, %51 : vector<1x16xi1>, vector<1x16xi32>
    %59 = vector.broadcast %22 : vector<8x1xi32> to vector<8x16xi32>
    %60 = vector.broadcast %58 : vector<1x16xi32> to vector<8x16xi32>
    %61 = arith.cmpi eq, %59, %60 : vector<8x16xi32>
    %cst_11 = arith.constant 9.99999993E-9 : f32
    %62 = vector.broadcast %cst_11 : f32 to vector<1x16xf32>
    %63 = arith.addf %57, %62 : vector<1x16xf32>
    %64 = tpu.reciprocal %63 : vector<1x16xf32> -> vector<1x16xf32>
    %65 = arith.extui %61 : vector<8x16xi1> to vector<8x16xi32>
    %66 = arith.sitofp %65 : vector<8x16xi32> to vector<8x16xf32>
    %67 = vector.broadcast %64 : vector<1x16xf32> to vector<8x16xf32>
    %68 = arith.mulf %66, %67 : vector<8x16xf32>
    %69 = arith.addf %23, %68 : vector<8x16xf32>
    %70 = arith.addf %24, %64 : vector<1x16xf32>
    %cst_12 = arith.constant 0x7F800000 : f32
    %71 = vector.broadcast %cst_12 : f32 to vector<8x16xf32>
    %72 = arith.select %61, %71, %21 : vector<8x16xi1>, vector<8x16xf32>
    %73 = vector.extract_strided_slice %72 {offsets = [0, 0], sizes = [4, 16], strides = [1, 1]} : vector<8x16xf32> to vector<4x16xf32>
    %74 = vector.extract_strided_slice %72 {offsets = [4, 0], sizes = [4, 16], strides = [1, 1]} : vector<8x16xf32> to vector<4x16xf32>
    %75 = arith.cmpf ole, %73, %74 : vector<4x16xf32>
    %76 = arith.select %75, %73, %74 : vector<4x16xi1>, vector<4x16xf32>
    %77 = tpu.iota {dimensions = array<i32: 0>} : vector<4x1xi32>
    %c4_i32_13 = arith.constant 4 : i32
    %78 = vector.broadcast %c4_i32_13 : i32 to vector<4x1xi32>
    %79 = arith.addi %77, %78 : vector<4x1xi32>
    %80 = vector.shape_cast %77 : vector<4x1xi32> to vector<4x1xi32>
    %81 = vector.broadcast %80 : vector<4x1xi32> to vector<4x16xi32>
    %82 = vector.shape_cast %79 : vector<4x1xi32> to vector<4x1xi32>
    %83 = vector.broadcast %82 : vector<4x1xi32> to vector<4x16xi32>
    %84 = arith.select %75, %81, %83 : vector<4x16xi1>, vector<4x16xi32>
    %85 = vector.extract_strided_slice %76 {offsets = [0, 0], sizes = [2, 16], strides = [1, 1]} : vector<4x16xf32> to vector<2x16xf32>
    %86 = vector.extract_strided_slice %76 {offsets = [2, 0], sizes = [2, 16], strides = [1, 1]} : vector<4x16xf32> to vector<2x16xf32>
    %87 = vector.extract_strided_slice %84 {offsets = [0, 0], sizes = [2, 16], strides = [1, 1]} : vector<4x16xi32> to vector<2x16xi32>
    %88 = vector.extract_strided_slice %84 {offsets = [2, 0], sizes = [2, 16], strides = [1, 1]} : vector<4x16xi32> to vector<2x16xi32>
    %89 = arith.cmpf olt, %85, %86 : vector<2x16xf32>
    %90 = arith.cmpf oeq, %85, %86 : vector<2x16xf32>
    %91 = arith.cmpi sle, %87, %88 : vector<2x16xi32>
    %92 = arith.andi %90, %91 : vector<2x16xi1>
    %93 = arith.ori %89, %92 : vector<2x16xi1>
    %94 = arith.select %93, %85, %86 : vector<2x16xi1>, vector<2x16xf32>
    %95 = arith.select %93, %87, %88 : vector<2x16xi1>, vector<2x16xi32>
    %96 = vector.extract_strided_slice %94 {offsets = [0, 0], sizes = [1, 16], strides = [1, 1]} : vector<2x16xf32> to vector<1x16xf32>
    %97 = vector.extract_strided_slice %94 {offsets = [1, 0], sizes = [1, 16], strides = [1, 1]} : vector<2x16xf32> to vector<1x16xf32>
    %98 = vector.extract_strided_slice %95 {offsets = [0, 0], sizes = [1, 16], strides = [1, 1]} : vector<2x16xi32> to vector<1x16xi32>
    %99 = vector.extract_strided_slice %95 {offsets = [1, 0], sizes = [1, 16], strides = [1, 1]} : vector<2x16xi32> to vector<1x16xi32>
    %100 = arith.cmpf olt, %96, %97 : vector<1x16xf32>
    %101 = arith.cmpf oeq, %96, %97 : vector<1x16xf32>
    %102 = arith.cmpi sle, %98, %99 : vector<1x16xi32>
    %103 = arith.andi %101, %102 : vector<1x16xi1>
    %104 = arith.ori %100, %103 : vector<1x16xi1>
    %105 = arith.select %104, %96, %97 : vector<1x16xi1>, vector<1x16xf32>
    %106 = arith.select %104, %98, %99 : vector<1x16xi1>, vector<1x16xi32>
    %107 = vector.broadcast %22 : vector<8x1xi32> to vector<8x16xi32>
    %108 = vector.broadcast %106 : vector<1x16xi32> to vector<8x16xi32>
    %109 = arith.cmpi eq, %107, %108 : vector<8x16xi32>
    %cst_14 = arith.constant 9.99999993E-9 : f32
    %110 = vector.broadcast %cst_14 : f32 to vector<1x16xf32>
    %111 = arith.addf %105, %110 : vector<1x16xf32>
    %112 = tpu.reciprocal %111 : vector<1x16xf32> -> vector<1x16xf32>
    %113 = arith.extui %109 : vector<8x16xi1> to vector<8x16xi32>
    %114 = arith.sitofp %113 : vector<8x16xi32> to vector<8x16xf32>
    %115 = vector.broadcast %112 : vector<1x16xf32> to vector<8x16xf32>
    %116 = arith.mulf %114, %115 : vector<8x16xf32>
    %117 = arith.addf %69, %116 : vector<8x16xf32>
    %118 = arith.addf %70, %112 : vector<1x16xf32>
    %cst_15 = arith.constant 0x7F800000 : f32
    %119 = vector.broadcast %cst_15 : f32 to vector<8x16xf32>
    %120 = arith.select %109, %119, %72 : vector<8x16xi1>, vector<8x16xf32>
    %121 = vector.extract_strided_slice %120 {offsets = [0, 0], sizes = [4, 16], strides = [1, 1]} : vector<8x16xf32> to vector<4x16xf32>
    %122 = vector.extract_strided_slice %120 {offsets = [4, 0], sizes = [4, 16], strides = [1, 1]} : vector<8x16xf32> to vector<4x16xf32>
    %123 = arith.cmpf ole, %121, %122 : vector<4x16xf32>
    %124 = arith.select %123, %121, %122 : vector<4x16xi1>, vector<4x16xf32>
    %125 = tpu.iota {dimensions = array<i32: 0>} : vector<4x1xi32>
    %c4_i32_16 = arith.constant 4 : i32
    %126 = vector.broadcast %c4_i32_16 : i32 to vector<4x1xi32>
    %127 = arith.addi %125, %126 : vector<4x1xi32>
    %128 = vector.shape_cast %125 : vector<4x1xi32> to vector<4x1xi32>
    %129 = vector.broadcast %128 : vector<4x1xi32> to vector<4x16xi32>
    %130 = vector.shape_cast %127 : vector<4x1xi32> to vector<4x1xi32>
    %131 = vector.broadcast %130 : vector<4x1xi32> to vector<4x16xi32>
    %132 = arith.select %123, %129, %131 : vector<4x16xi1>, vector<4x16xi32>
    %133 = vector.extract_strided_slice %124 {offsets = [0, 0], sizes = [2, 16], strides = [1, 1]} : vector<4x16xf32> to vector<2x16xf32>
    %134 = vector.extract_strided_slice %124 {offsets = [2, 0], sizes = [2, 16], strides = [1, 1]} : vector<4x16xf32> to vector<2x16xf32>
    %135 = vector.extract_strided_slice %132 {offsets = [0, 0], sizes = [2, 16], strides = [1, 1]} : vector<4x16xi32> to vector<2x16xi32>
    %136 = vector.extract_strided_slice %132 {offsets = [2, 0], sizes = [2, 16], strides = [1, 1]} : vector<4x16xi32> to vector<2x16xi32>
    %137 = arith.cmpf olt, %133, %134 : vector<2x16xf32>
    %138 = arith.cmpf oeq, %133, %134 : vector<2x16xf32>
    %139 = arith.cmpi sle, %135, %136 : vector<2x16xi32>
    %140 = arith.andi %138, %139 : vector<2x16xi1>
    %141 = arith.ori %137, %140 : vector<2x16xi1>
    %142 = arith.select %141, %133, %134 : vector<2x16xi1>, vector<2x16xf32>
    %143 = arith.select %141, %135, %136 : vector<2x16xi1>, vector<2x16xi32>
    %144 = vector.extract_strided_slice %142 {offsets = [0, 0], sizes = [1, 16], strides = [1, 1]} : vector<2x16xf32> to vector<1x16xf32>
    %145 = vector.extract_strided_slice %142 {offsets = [1, 0], sizes = [1, 16], strides = [1, 1]} : vector<2x16xf32> to vector<1x16xf32>
    %146 = vector.extract_strided_slice %143 {offsets = [0, 0], sizes = [1, 16], strides = [1, 1]} : vector<2x16xi32> to vector<1x16xi32>
    %147 = vector.extract_strided_slice %143 {offsets = [1, 0], sizes = [1, 16], strides = [1, 1]} : vector<2x16xi32> to vector<1x16xi32>
    %148 = arith.cmpf olt, %144, %145 : vector<1x16xf32>
    %149 = arith.cmpf oeq, %144, %145 : vector<1x16xf32>
    %150 = arith.cmpi sle, %146, %147 : vector<1x16xi32>
    %151 = arith.andi %149, %150 : vector<1x16xi1>
    %152 = arith.ori %148, %151 : vector<1x16xi1>
    %153 = arith.select %152, %144, %145 : vector<1x16xi1>, vector<1x16xf32>
    %154 = arith.select %152, %146, %147 : vector<1x16xi1>, vector<1x16xi32>
    %155 = vector.broadcast %22 : vector<8x1xi32> to vector<8x16xi32>
    %156 = vector.broadcast %154 : vector<1x16xi32> to vector<8x16xi32>
    %157 = arith.cmpi eq, %155, %156 : vector<8x16xi32>
    %cst_17 = arith.constant 9.99999993E-9 : f32
    %158 = vector.broadcast %cst_17 : f32 to vector<1x16xf32>
    %159 = arith.addf %153, %158 : vector<1x16xf32>
    %160 = tpu.reciprocal %159 : vector<1x16xf32> -> vector<1x16xf32>
    %161 = arith.extui %157 : vector<8x16xi1> to vector<8x16xi32>
    %162 = arith.sitofp %161 : vector<8x16xi32> to vector<8x16xf32>
    %163 = vector.broadcast %160 : vector<1x16xf32> to vector<8x16xf32>
    %164 = arith.mulf %162, %163 : vector<8x16xf32>
    %165 = arith.addf %117, %164 : vector<8x16xf32>
    %166 = arith.addf %118, %160 : vector<1x16xf32>
    %cst_18 = arith.constant dense<0.000000e+00> : vector<8x16xf32>
    %167 = tpu.matmul %5, %165, %cst_18 {dimension_numbers = #tpu.dot_dimension_numbers<[1], [0], [0], [1], [0, 0, 1, 1], [], []>} : vector<8x8xf32>, vector<8x16xf32>, vector<8x16xf32> -> vector<8x16xf32>
    %168 = tpu.reciprocal %166 : vector<1x16xf32> -> vector<1x16xf32>
    %169 = vector.broadcast %168 : vector<1x16xf32> to vector<8x16xf32>
    %170 = arith.mulf %167, %169 : vector<8x16xf32>
    %c0_19 = arith.constant 0 : index
    %c0_20 = arith.constant 0 : index
    %171 = vector.load %arg6[%c0_19, %c0_20] : memref<32x4xf32, #tpu.memory_space<vmem>>, vector<32x4xf32>
    %c0_21 = arith.constant 0 : index
    %c0_22 = arith.constant 0 : index
    %172 = vector.load %arg7[%c0_21, %c0_22] : memref<32x8xf32, #tpu.memory_space<vmem>>, vector<32x8xf32>
    %c0_23 = arith.constant 0 : index
    %c0_24 = arith.constant 0 : index
    %173 = vector.load %arg8[%c0_23, %c0_24] : memref<32x1xf32, #tpu.memory_space<vmem>>, vector<32x1xf32>
    %c0_25 = arith.constant 0 : index
    %c0_26 = arith.constant 0 : index
    %c0_27 = arith.constant 0 : index
    %174 = vector.load %arg5[%c0_25, %c0_26, %c0_27] : memref<1x4x16xf32, #tpu.memory_space<vmem>>, vector<1x4x16xf32>
    %175 = vector.shape_cast %174 : vector<1x4x16xf32> to vector<4x16xf32>
    %cst_28 = arith.constant dense<0.000000e+00> : vector<32x16xf32>
    %176 = tpu.matmul %171, %175, %cst_28 {dimension_numbers = #tpu.dot_dimension_numbers<[1], [0], [0], [1], [0, 0, 1, 1], [], []>} : vector<32x4xf32>, vector<4x16xf32>, vector<32x16xf32> -> vector<32x16xf32>
    %cst_29 = arith.constant dense<0.000000e+00> : vector<32x16xf32>
    %177 = tpu.matmul %172, %170, %cst_29 {dimension_numbers = #tpu.dot_dimension_numbers<[1], [0], [0], [1], [0, 0, 1, 1], [], []>} : vector<32x8xf32>, vector<8x16xf32>, vector<32x16xf32> -> vector<32x16xf32>
    %178 = arith.addf %176, %177 : vector<32x16xf32>
    %179 = vector.broadcast %173 : vector<32x1xf32> to vector<32x16xf32>
    %180 = arith.addf %178, %179 : vector<32x16xf32>
    %cst_30 = arith.constant 0.000000e+00 : f32
    %181 = vector.broadcast %cst_30 : f32 to vector<32x16xf32>
    %182 = arith.maximumf %180, %181 : vector<32x16xf32>
    %c0_31 = arith.constant 0 : index
    %c0_32 = arith.constant 0 : index
    %183 = vector.load %arg9[%c0_31, %c0_32] : memref<16x32xf32, #tpu.memory_space<vmem>>, vector<16x32xf32>
    %c0_33 = arith.constant 0 : index
    %c0_34 = arith.constant 0 : index
    %184 = vector.load %arg10[%c0_33, %c0_34] : memref<16x1xf32, #tpu.memory_space<vmem>>, vector<16x1xf32>
    %cst_35 = arith.constant dense<0.000000e+00> : vector<16x16xf32>
    %185 = tpu.matmul %183, %182, %cst_35 {dimension_numbers = #tpu.dot_dimension_numbers<[1], [0], [0], [1], [0, 0, 1, 1], [], []>} : vector<16x32xf32>, vector<32x16xf32>, vector<16x16xf32> -> vector<16x16xf32>
    %186 = vector.broadcast %184 : vector<16x1xf32> to vector<16x16xf32>
    %187 = arith.addf %185, %186 : vector<16x16xf32>
    %cst_36 = arith.constant 0.000000e+00 : f32
    %188 = vector.broadcast %cst_36 : f32 to vector<16x16xf32>
    %189 = arith.maximumf %187, %188 : vector<16x16xf32>
    %c0_37 = arith.constant 0 : index
    %c0_38 = arith.constant 0 : index
    %c0_39 = arith.constant 0 : index
    %190 = vector.load %arg11[%c0_37, %c0_38, %c0_39] : memref<1x16x16xf32, #tpu.memory_space<vmem>>, vector<1x16x16xf32>
    %191 = vector.shape_cast %190 : vector<1x16x16xf32> to vector<16x16xf32>
    %192 = vector.shape_cast %189 : vector<16x16xf32> to vector<1x16x16xf32>
    tpu.vector_store %arg11[%c0_37, %c0_38, %c0_39], %192 {strides = array<i32>} : memref<1x16x16xf32, #tpu.memory_space<vmem>>, vector<1x16x16xf32>,
    return
  }
  func.func @transform_0(%arg0: i32, %arg1: i32) -> (i32, i32, i32) {
    %c0_i32 = arith.constant 0 : i32
    %c0_i32_0 = arith.constant 0 : i32
    return %arg0, %c0_i32, %arg1 : i32, i32, i32
  }
  func.func @transform_1(%arg0: i32, %arg1: i32) -> (i32, i32, i32) {
    %c0_i32 = arith.constant 0 : i32
    %c0_i32_0 = arith.constant 0 : i32
    %c0_i32_1 = arith.constant 0 : i32
    return %arg0, %c0_i32, %c0_i32_0 : i32, i32, i32
  }
  func.func @transform_2(%arg0: i32, %arg1: i32) -> (i32, i32, i32) {
    %c0_i32 = arith.constant 0 : i32
    %c0_i32_0 = arith.constant 0 : i32
    %c0_i32_1 = arith.constant 0 : i32
    return %arg0, %c0_i32, %c0_i32_0 : i32, i32, i32
  }
  func.func @transform_3(%arg0: i32, %arg1: i32) -> (i32, i32, i32) {
    %c0_i32 = arith.constant 0 : i32
    %c0_i32_0 = arith.constant 0 : i32
    return %arg0, %c0_i32, %arg1 : i32, i32, i32
  }
  func.func @transform_4(%arg0: i32, %arg1: i32) -> (i32, i32) {
    %c0_i32 = arith.constant 0 : i32
    %c0_i32_0 = arith.constant 0 : i32
    %c0_i32_1 = arith.constant 0 : i32
    return %c0_i32, %c0_i32_0 : i32, i32
  }
  func.func @transform_5(%arg0: i32, %arg1: i32) -> (i32, i32) {
    %c0_i32 = arith.constant 0 : i32
    %c0_i32_0 = arith.constant 0 : i32
    %c0_i32_1 = arith.constant 0 : i32
    return %c0_i32, %c0_i32_0 : i32, i32
  }
  func.func @transform_6(%arg0: i32, %arg1: i32) -> (i32, i32) {
    %c0_i32 = arith.constant 0 : i32
    %c0_i32_0 = arith.constant 0 : i32
    %c0_i32_1 = arith.constant 0 : i32
    return %c0_i32, %c0_i32_0 : i32, i32
  }
  func.func @transform_7(%arg0: i32, %arg1: i32) -> (i32, i32) {
    %c0_i32 = arith.constant 0 : i32
    %c0_i32_0 = arith.constant 0 : i32
    %c0_i32_1 = arith.constant 0 : i32
    return %c0_i32, %c0_i32_0 : i32, i32
  }
  func.func @transform_8(%arg0: i32, %arg1: i32) -> (i32, i32) {
    %c0_i32 = arith.constant 0 : i32
    %c0_i32_0 = arith.constant 0 : i32
    %c0_i32_1 = arith.constant 0 : i32
    return %c0_i32, %c0_i32_0 : i32, i32
  }
  func.func @transform_9(%arg0: i32, %arg1: i32) -> (i32, i32, i32) {
    %c0_i32 = arith.constant 0 : i32
    %c0_i32_0 = arith.constant 0 : i32
    return %arg0, %c0_i32, %arg1 : i32, i32, i32
  }
}

</mosaic_0001>

<bundles_post_ra>
// kernel: tpu_custom_call.1
= control target key start
LH: loop header
LB: loop body
LE: loop exit
PB: predicated region body
PF: predicated region fallthrough
CT: control target
= control target key end

     0   :  { %s1421_s0 = inlined_call_operand.vmem [shape: f32[2,4,16], index: 0, kind: input, shape index: {}]   ;;  %s1422_s1 = inlined_call_operand.vmem [shape: f32[2,8,4], index: 1, kind: input, shape index: {}]   ;;  %s1423_s2 = inlined_call_operand.vmem [shape: f32[2,8,8], index: 2, kind: input, shape index: {}]   ;;  %s1424_s3 = inlined_call_operand.vmem [shape: f32[2,4,16], index: 3, kind: input, shape index: {}]   ;;  %s1425_s4 = inlined_call_operand.vmem [shape: f32[32,4], index: 4, kind: input, shape index: {}]   ;;  %s1426_s5 = inlined_call_operand.vmem [shape: f32[32,8], index: 5, kind: input, shape index: {}]   ;;  %s1427_s6 = inlined_call_operand.vmem [shape: f32[32,1], index: 6, kind: input, shape index: {}]   ;;  %s1428_s7 = inlined_call_operand.vmem [shape: f32[16,32], index: 7, kind: input, shape index: {}]   ;;  %s1429_s8 = inlined_call_operand.vmem [shape: f32[16,1], index: 8, kind: input, shape index: {}]   ;;  %s1430_s9 = inlined_call_operand.hbm [shape: f32[2,16,16], index: 9, kind: output, shape index: {}]  }
   0x1   :  { %1431 = sst [smem:[#allocation5_spill]] %s1421_s0 }
   0x2   :  { %14 = vsyncpa [#allocation3], 0 }
   0x3   :  { %16 = vsyncpa [#allocation3 + $0x1], 0  ;;  %s1199_s30 = smov 0   ;;  %s1201_s10 = smov 0  }
   0x4   :  { %s1203_s11 = smov 0   ;;  %s1205_s12 = smov 0  }
   0x5   :  { %s1207_s13 = smov 0   ;;  %s1209_s14 = smov 0  }
   0x6 LB: > { %s960_s15 = sadd.s32 4294967295, %s1143_s14   ;;  %s961_s16 = sadd.s32 4294967294, %s1143_s14   ;;  %s1143_s14 = sphi %s1209_s14, %s22_s14   ;;  %s1139_s13 = sphi %s1207_s13, %s1445_s13   ;;  %s1135_s12 = sphi %s1205_s12, %s1444_s12   ;;  %s1131_s11 = sphi %s1203_s11, %s1443_s11   ;;  %s1127_s10 = sphi %s1201_s10, %s1442_s10   ;;  %s1123_s30 = sphi %s1199_s30, %s1441_s30  }
   0x7   : > { %s34_s17 = sadd.s32 1, %s1139_s13  ;;  %s256_s18 = sadd.s32 1, %s1131_s11 }
   0x8   : > { %p36_p0 = scmp.ge.s32.totalorder %s34_s17, 2  ;;  %p266_p1 = scmp.ne.s32.totalorder %s1131_s11, %s1127_s10 }
   0x9   : > { %p267_p2 = scmp.eq.s32.totalorder %s960_s15, 1  ;;  %p272_p3 = scmp.ne.s32.totalorder %s1127_s10, %s1123_s30 }
   0xa   : > { %s1447_s17 = smov (%p36_p0, %s34_s17), 0  ;;  %p273_p5 = scmp.eq.s32.totalorder %s961_s16, 1 }
   0xb   : > { %p1239_p4 = por %p267_p2, %p266_p1  ;;  %s251_s20 = ssub.s32 %s1139_s13, %s1447_s17 }
   0xc   : > { %p964_p6 = scmp.ge.s32.totalorder %s1143_s14, 1  ;;  %p254_p7 = scmp.eq.s32.totalorder %s251_s20, 0 }
   0xd   : > { %p1246_p8 = por %p273_p5, %p272_p3  ;;  %p340_p9 = scmp.lt.s32.totalorder %s1143_s14, 3 }
   0xe   : > { %s1252_s22 = scalar_select %p254_p7, %s1131_s11, %s256_s18  }
   0xf   : > { %p341_p10 = pnand %p964_p6, %p340_p9 }
  0x10   : > { %p393_p11 = scmp.lt.s32.totalorder (!%p341_p10), %s1135_s12, 1  ;;  %s1434_s0 = sld [smem:[#allocation5_spill]] (!%p341_p10) }
  0x11   : > { %344 = sbr.rel (%p341_p10) target bundleno = 672 (0x2a0), region = 56 }
  0x16   : > { %s1256_s23 = scalar_select %p393_p11, %s1135_s12, 1  ;;  %vm431_vm0 = vcmask 1043456   ;;  %vm427_vm1 = vcmask 31744   ;;  %v456_v7 = vlaneseq }
  0x18   : > { %s966_s24 = sshll.u32 %s1256_s23, 2  ;;  %s967_s25 = sshll.u32 %s1256_s23, 3  ;;  %v1272_v10 = vshrl.u32 %v456_v7, 7 }
  0x19   : > { %s399_s28 = scalar_lea.vmem %s1434_s0, %s966_s24  ;;  %s403_s16 = scalar_lea.vmem %s1422_s1, %s967_s25 }
  0x1a   : > { %v415_v0 = vld [vmem:[%s399_s28] sm:$0xf]  ;;  %v1275_v13 = vadd.s32 4, %v1272_v10  ;;  %s407_s26 = scalar_lea.vmem %s1423_s2, %s967_s25  ;;  %s414_s29 = scalar_lea.vmem %s1424_s3, %s966_s24 }
  0x1b   : > { %v416_v1 = vld [vmem:[%s403_s16] sm:$0xff]  ;;  %970 = vmatpush.msk.msra.mxu0 %vm431_vm0, %v415_v0  ;;  %v418_v2 = vmul.f32 %v415_v0, %v415_v0  ;;  %s992_s16 = sshll.u32 %s1135_s12, 4 }
  0x1c   : > { %971 = vmatmul.msk.f32.vlgmr.msra.gmra.mxu0 %vm427_vm1, %v416_v1  ;;  %v666_v25 = vld [vmem:[%s414_s29] sm:$0xf]  ;;  %s390_s29 = sand.u32 1, %s1127_s10   ;;  %s842_s24 = scalar_lea.hbm %s1430_s9, %s992_s16 }
  0x1d   : > { %v420_v3 = vrot.slane %v418_v2, 1  ;;  %v423_v5 = vrot.slane %v418_v2, 2  ;;  %994 = vmatpush.msk.msra.mxu3 %vm431_vm0, %v666_v25  ;;  %v654_v0 = vld [vmem:[%s1425_s4] sm:$0xff]  ;;  %s965_s15 = sshll.u32 %s390_s29, 4  ;;  %s830_s27 = scalar_lea.sflag [#allocation3], %s390_s29 }
  0x1e   : > { %s392_s25 = scalar_lea.vmem [#allocation2], %s965_s15  ;;  %s1085_s16 = scalar_lea.hbm %s1430_s9, 32 }
  0x1f   : > { %v422_v4 = vadd.f32 %v420_v3, %v418_v2  ;;  %s843_s20 = sshll.u32 %s392_s25, 4  ;;  %s844_s20 = int_to_ptr.vmem [resolvable:$true] %s843_s20 }
  0x21   : > { %v425_v6 = vadd.f32 %v423_v5, %v422_v4 }
  0x23   : > { %v426_v8 = vperm.slane %v425_v6, 0 }
  0x99   : > { %v452_v9 = vpop.f32.mrf.mxu0 }
  0x9a   : > { %v453_v11 = vadd.f32 %v452_v9, %v426_v8 }
  0x9c   : > { %v455_v12 = vmax.f32 %v453_v11, 0.0 }
  0x9e   : > { %v459_v14 = vrot.slane %v455_v12, 4 }
  0xa0   : > { %vm461_vm2 = vcmp.le.f32.partialorder %v455_v12, %v459_v14 }
  0xa1   : > { %v462_v15 = vsel %vm461_vm2, %v455_v12, %v459_v14  ;;  %v464_v16 = vsel %vm461_vm2, %v1272_v10, %v1275_v13 }
  0xa2   : > { %v466_v17 = vrot.slane %v462_v15, 2  ;;  %v470_v18 = vrot.slane %v464_v16, 2 }
  0xa4   : > { %vm468_vm3 = vcmp.lt.f32.partialorder %v462_v15, %v466_v17  ;;  %vm469_vm4 = vcmp.eq.f32.partialorder %v462_v15, %v466_v17  ;;  %vm471_vm5 = vcmp.le.s32.totalorder %v464_v16, %v470_v18 }
  0xa5   : > { %vm472_vm6 = vmand %vm469_vm4, %vm471_vm5 }
  0xa6   : > { %vm473_vm7 = vmor %vm468_vm3, %vm472_vm6 }
  0xa7   : > { %v474_v19 = vsel %vm473_vm7, %v462_v15, %v466_v17  ;;  %v475_v20 = vsel %vm473_vm7, %v464_v16, %v470_v18 }
  0xa8   : > { %v477_v21 = vrot.slane %v474_v19, 1  ;;  %v481_v22 = vrot.slane %v475_v20, 1 }
  0xaa   : > { %vm479_vm8 = vcmp.lt.f32.partialorder %v474_v19, %v477_v21  ;;  %vm480_vm9 = vcmp.eq.f32.partialorder %v474_v19, %v477_v21  ;;  %vm482_vm10 = vcmp.le.s32.totalorder %v475_v20, %v481_v22 }
  0xab   : > { %vm483_vm11 = vmand %vm480_vm9, %vm482_vm10 }
  0xac   : > { %vm484_vm12 = vmor %vm479_vm8, %vm483_vm11 }
  0xad   : > { %v486_v23 = vsel %vm484_vm12, %v475_v20, %v481_v22  ;;  %v485_v26 = vsel %vm484_vm12, %v474_v19, %v477_v21 }
  0xae   : > { %v487_v24 = vperm.slane %v486_v23, 0  ;;  %v1286_v29 = vadd.f32 1e-08, %v485_v26  ;;  %v1145_v26 = vmov 0.0  }
  0xb0   : > { %vm1280_vm13 = vcmp.eq.s32.totalorder %v1272_v10, %v487_v24  ;;  %1057 = vrcp.f32 %v1286_v29  ;;  %v501_v56 = vand.u32 2147483648, %v1286_v29  ;;  %v499_v58 = vand.u32 2147483647, %v1286_v29 }
  0xb1   : > { %v510_v27 = vsel %vm1280_vm13, inf, %v455_v12 }
  0xb2   : > { %v512_v28 = vrot.slane %v510_v27, 4  ;;  %v502_v4 = vor.u32 1.1754944e-38, %v501_v56 }
  0xb4   : > { %vm514_vm14 = vcmp.le.f32.partialorder %v510_v27, %v512_v28 }
  0xb5   : > { %v515_v30 = vsel %vm514_vm14, %v510_v27, %v512_v28  ;;  %v516_v31 = vsel %vm514_vm14, %v1272_v10, %v1275_v13 }
  0xb6   : > { %v518_v32 = vrot.slane %v515_v30, 2  ;;  %v522_v33 = vrot.slane %v516_v31, 2  ;;  %v1058_v38 = vpop.eup %1057 }
  0xb7   : > { %v491_v39 = vmul.f32 %v1058_v38, %v1286_v29 }
  0xb8   : > { %vm520_vm15 = vcmp.lt.f32.partialorder %v515_v30, %v518_v32  ;;  %vm521_vm2 = vcmp.eq.f32.partialorder %v515_v30, %v518_v32  ;;  %vm523_vm3 = vcmp.le.s32.totalorder %v516_v31, %v522_v33 }
  0xb9   : > { %vm524_vm4 = vmand %vm521_vm2, %vm523_vm3  ;;  %v492_v45 = vsub.f32 1.0, %v491_v39  ;;  %vm496_vm3 = vweird.f32 %v1058_v38 }
  0xba   : > { %vm525_vm5 = vmor %vm520_vm15, %vm524_vm4 }
  0xbb   : > { %v526_v34 = vsel %vm525_vm5, %v515_v30, %v518_v32  ;;  %v527_v35 = vsel %vm525_vm5, %v516_v31, %v522_v33  ;;  %v493_v48 = vmul.f32 %v1058_v38, %v492_v45  ;;  %vm495_vm5 = vweird.f32 %v1286_v29 }
  0xbc   : > { %v529_v36 = vrot.slane %v526_v34, 1  ;;  %v533_v37 = vrot.slane %v527_v35, 1  ;;  %v972_v31 = vsel %vm1280_vm13, 1.0, %v1145_v26 }
  0xbd   : > { %v494_v55 = vadd.f32 %v1058_v38, %v493_v48  ;;  %v663_v48 = vld [vmem:[%s1427_s6 + $0x8] sm:$0xff] }
  0xbe   : > { %vm531_vm6 = vcmp.lt.f32.partialorder %v526_v34, %v529_v36  ;;  %vm532_vm7 = vcmp.eq.f32.partialorder %v526_v34, %v529_v36  ;;  %vm534_vm8 = vcmp.le.s32.totalorder %v527_v35, %v533_v37 }
  0xbf   : > { %vm535_vm9 = vmand %vm532_vm7, %vm534_vm8 }
  0xc0   : > { %vm536_vm10 = vmor %vm531_vm6, %vm535_vm9 }
  0xc1   : > { %v537_v40 = vsel %vm536_vm10, %v526_v34, %v529_v36  ;;  %v538_v41 = vsel %vm536_vm10, %v527_v35, %v533_v37  ;;  %vm1304_vm8 = vmor %vm495_vm5, %vm496_vm3 }
  0xc2   : > { %v539_v42 = vperm.slane %v538_v41, 0  ;;  %v541_v43 = vadd.f32 1e-08, %v537_v40  ;;  %v498_v3 = vsel %vm1304_vm8, %v1058_v38, %v494_v55  ;;  %v655_v40 = vld [vmem:[%s1425_s4 + $0x8] sm:$0xff]  ;;  %v662_v55 = vld [vmem:[%s1427_s6] sm:$0xff] }
  0xc3   : > { %982 = vmatmul.msk.f32.vlgmr.msra.gmra.mxu3 %vm427_vm1, %v655_v40 }
  0xc4   : > { %vm1293_vm11 = vcmp.eq.s32.totalorder %v1272_v10, %v539_v42  ;;  %1059 = vrcp.f32 %v541_v43  ;;  %v551_v59 = vand.u32 2147483647, %v541_v43  ;;  %v553_v60 = vand.u32 2147483648, %v541_v43 }
  0xc5   : > { %v562_v46 = vsel %vm1293_vm11, inf, %v510_v27  ;;  %vm547_vm9 = vweird.f32 %v541_v43  ;;  %v973_v27 = vsel %vm1293_vm11, 1.0, %v1145_v26  ;;  %vm614_vm11 = vcmask 64512  }
  0xc6   : > { %v564_v47 = vrot.slane %v562_v46, 4  ;;  %v554_v6 = vor.u32 1.1754944e-38, %v553_v60 }
  0xc8   : > { %vm566_vm12 = vcmp.le.f32.partialorder %v562_v46, %v564_v47 }
  0xc9   : > { %v567_v49 = vsel %vm566_vm12, %v562_v46, %v564_v47  ;;  %v568_v50 = vsel %vm566_vm12, %v1272_v10, %v1275_v13  ;;  %v657_v46 = vld [vmem:[%s1425_s4 + $0x18] sm:$0xff] }
  0xca   : > { %v1060_v51 = vpop.eup %1059  ;;  %v570_v52 = vrot.slane %v567_v49, 2  ;;  %v574_v53 = vrot.slane %v568_v50, 2  ;;  %v665_v47 = vld [vmem:[%s1427_s6 + $0x18] sm:$0xff] }
  0xcb   : > { %v543_v54 = vmul.f32 %v1060_v51, %v541_v43  ;;  %vm548_vm7 = vweird.f32 %v1060_v51  ;;  %v656_v43 = vld [vmem:[%s1425_s4 + $0x10] sm:$0xff] }
  0xcc   : > { %vm572_vm14 = vcmp.lt.f32.partialorder %v567_v49, %v570_v52  ;;  %vm573_vm15 = vcmp.eq.f32.partialorder %v567_v49, %v570_v52  ;;  %vm575_vm2 = vcmp.le.s32.totalorder %v568_v50, %v574_v53  ;;  %vm549_vm10 = vmor %vm547_vm9, %vm548_vm7  ;;  %983 = vmatmul.msk.f32.gmra.mxu3 %vm427_vm1, %v656_v43 }
  0xcd   : > { %v544_v57 = vsub.f32 1.0, %v543_v54  ;;  %vm576_vm4 = vmand %vm573_vm15, %vm575_vm2  ;;  %vm500_vm2 = vcmp.eq.f32.partialorder %v499_v58, 8.507059e+37 }
  0xce   : > { %vm577_vm6 = vmor %vm572_vm14, %vm576_vm4  ;;  %vm552_vm4 = vcmp.eq.f32.partialorder %v551_v59, 8.507059e+37  ;;  %v503_v8 = vsel %vm500_vm2, %v502_v4, %v498_v3 }
  0xcf   : > { %v545_v61 = vmul.f32 %v1060_v51, %v544_v57  ;;  %v578_v62 = vsel %vm577_vm6, %v567_v49, %v570_v52  ;;  %v579_v63 = vsel %vm577_vm6, %v568_v50, %v574_v53  ;;  %v506_v23 = vperm.slane %v503_v8, 0  ;;  %v664_v57 = vld [vmem:[%s1427_s6 + $0x10] sm:$0xff] }
  0xd0   : > { %v581_v1 = vrot.slane %v578_v62, 1  ;;  %v585_v2 = vrot.slane %v579_v63, 1  ;;  %v1146_v50 = vmov 0  }
  0xd1   : > { %v546_v5 = vadd.f32 %v1060_v51, %v545_v61  ;;  %v507_v33 = vmul.f32 %v972_v31, %v506_v23  ;;  %1055 = vset.pattern.permute.xlu1 %v1146_v50  ;;  %1054 = vset.pattern.permute.xlu0 %v1146_v50  ;;  %v659_v61 = vld [vmem:[%s1426_s5 + $0x8] sm:$0xff] }
  0xd2   : > { %vm583_vm12 = vcmp.lt.f32.partialorder %v578_v62, %v581_v1  ;;  %vm584_vm14 = vcmp.eq.f32.partialorder %v578_v62, %v581_v1  ;;  %vm586_vm15 = vcmp.le.s32.totalorder %v579_v63, %v585_v2  ;;  %759 = vperm.xlu1 %1055, %v663_v48   ;;  %769 = vperm.xlu0 %1054, %v665_v47   ;;  %v781_v31 = vld [vmem:[%s1428_s7 + $0x8] sm:$0xff] }
  0xd3   : > { %v550_v7 = vsel %vm549_vm10, %v1060_v51, %v546_v5  ;;  %vm587_vm3 = vmand %vm584_vm14, %vm586_vm15  ;;  %1056 = vset.pattern.permute.xlu2 %v1146_v50 }
  0xd4   : > { %v555_v9 = vsel %vm552_vm4, %v554_v6, %v550_v7  ;;  %vm588_vm5 = vmor %vm583_vm12, %vm587_vm3  ;;  %984 = vmatmul.msk.f32.gmra.mxu3 %vm427_vm1, %v657_v46  ;;  %v782_v7 = vld [vmem:[%s1429_s8] sm:$0xff] }
  0xd5   : > { %v561_v11 = vadd.f32 %v555_v9, %v503_v8  ;;  %v589_v12 = vsel %vm588_vm5, %v578_v62, %v581_v1  ;;  %v590_v16 = vsel %vm588_vm5, %v579_v63, %v585_v2  ;;  %v558_v18 = vperm.slane %v555_v9, 0  ;;  %v658_v62 = vld [vmem:[%s1426_s5] sm:$0xff]  ;;  %v660_v63 = vld [vmem:[%s1426_s5 + $0x10] sm:$0xff]  ;;  %v661_v1 = vld [vmem:[%s1426_s5 + $0x18] sm:$0xff]  ;;  %786 = vperm.xlu2 %1056, %v782_v7  }
  0xd6   : > { %v593_v13 = vadd.f32 1e-08, %v589_v12  ;;  %v591_v20 = vperm.slane %v590_v16, 0 }
  0xd7   : > { %v559_v29 = vmul.f32 %v973_v27, %v558_v18 }
  0xd8   : > { %1061 = vrcp.f32 %v593_v13  ;;  %v605_v19 = vand.u32 2147483648, %v593_v13  ;;  %v603_v22 = vand.u32 2147483647, %v593_v13  ;;  %vm599_vm7 = vweird.f32 %v593_v13 }
  0xd9   : > { %vm592_vm9 = vcmp.eq.s32.totalorder %v1272_v10, %v591_v20  ;;  %v560_v37 = vadd.f32 %v559_v29, %v507_v33  ;;  %v417_v10 = vld [vmem:[%s407_s26] sm:$0xff]  ;;  %s845_s26 = sshll.u32 %s842_s24, 4  ;;  %s846_s26 = int_to_ptr.hbm [resolvable:$true] %s845_s26 }
  0xda   : > { %v606_v28 = vor.u32 1.1754944e-38, %v605_v19  ;;  %vm604_vm10 = vcmp.eq.f32.partialorder %v603_v22, 8.507059e+37  ;;  %v974_v36 = vsel %vm592_vm9, 1.0, %v1145_v26  ;;  %754 = vperm.xlu1 %1055, %v662_v55   ;;  %764 = vperm.xlu0 %1054, %v664_v57   ;;  %s1079_s28 = sshra.s32 %s846_s26, 4  ;;  %s1080_s28 = int_to_ptr.hbm [resolvable:$true] %s1079_s28 }
  0xdb   : > { %s1081_s12 = scalar_lea.hbm %s1080_s28, 16  ;;  %p1086_p1 = scmp.lt.s32.totalorder %s1080_s28, %s1430_s9 }
  0xdc   : > { %p1082_p12 = scmp.ne.s32.totalorder %s1080_s28, %s1081_s12  ;;  %p1087_p2 = scmp.lt.s32.totalorder %s1085_s16, %s1081_s12 }
  0xde   : > { %v1062_v14 = vpop.eup %1061  ;;  %p1083_p13 = pnand %p1082_p12, %p1239_p4  ;;  %p1088_p3 = por %p1087_p2, %p1086_p1 }
  0xdf   : > { %v595_v15 = vmul.f32 %v1062_v14, %v593_v13  ;;  %vm600_vm6 = vweird.f32 %v1062_v14 }
  0xe0   : > { %vm601_vm8 = vmor %vm599_vm7, %vm600_vm6  ;;  %p1084_p0 = pneg %p1083_p13 }
  0xe1   : > { %v596_v17 = vsub.f32 1.0, %v595_v15 }
  0xe2   : > { %p1089_p5 = pnand %p1088_p3, %p1084_p0 }
  0xe3   : > { %v597_v21 = vmul.f32 %v1062_v14, %v596_v17 }
  0xe5   : > { %v598_v24 = vadd.f32 %v1062_v14, %v597_v21 }
  0xe7   : > { %v602_v30 = vsel %vm601_vm8, %v1062_v14, %v598_v24 }
  0xe8   : > { %v607_v32 = vsel %vm604_vm10, %v606_v28, %v602_v30  ;;  %v780_v30 = vld [vmem:[%s1428_s7] sm:$0xff] }
  0xe9   : > { %v610_v34 = vperm.slane %v607_v32, 0  ;;  %v613_v35 = vadd.f32 %v607_v32, %v561_v11  ;;  %v783_v11 = vld [vmem:[%s1429_s8 + $0x8] sm:$0xff] }
  0xea   : > { %791 = vperm.xlu2 %1056, %v783_v11  }
  0xeb   : > { %v611_v38 = vmul.f32 %v974_v36, %v610_v34  ;;  %1063 = vrcp.f32 %v613_v35  ;;  %v649_v51 = vand.u32 2147483648, %v613_v35  ;;  %vm643_vm12 = vweird.f32 %v613_v35 }
  0xec   : > { %v647_v52 = vand.u32 2147483647, %v613_v35 }
  0xed   : > { %v612_v39 = vadd.f32 %v611_v38, %v560_v37  ;;  %v650_v54 = vor.u32 1.1754944e-38, %v649_v51 }
  0xee   : > { %vm648_vm15 = vcmp.eq.f32.partialorder %v647_v52, 8.507059e+37 }
  0xef   : > { %633 = vmatpush.msra.mxu1 %v612_v39 }
  0xf0   : > { %975 = vmatmul.msk.f32.vlgmr.msra.gmra.mxu1 %vm614_vm11, %v417_v10 }
  0xf1   : > { %v1064_v41 = vpop.eup %1063 }
  0xf2   : > { %v639_v42 = vmul.f32 %v1064_v41, %v613_v35  ;;  %vm644_vm13 = vweird.f32 %v1064_v41 }
  0xf3   : > { %vm645_vm14 = vmor %vm643_vm12, %vm644_vm13 }
  0xf4   : > { %v640_v44 = vsub.f32 1.0, %v639_v42 }
  0xf6   : > { %v641_v45 = vmul.f32 %v1064_v41, %v640_v44 }
  0xf8   : > { %v642_v49 = vadd.f32 %v1064_v41, %v641_v45 }
  0xfa   : > { %v646_v53 = vsel %vm645_vm14, %v1064_v41, %v642_v49 }
  0xfb   : > { %v651_v56 = vsel %vm648_vm15, %v650_v54, %v646_v53 }
  0xfc   : > { %v652_v58 = vperm.slane %v651_v56, 0 }
 0x12f   : > { %v787_v32 = vpop.permute.xlu2 %786 }
 0x144   : > { %v770_v5 = vpop.permute.xlu0 %769  ;;  %v760_v9 = vpop.permute.xlu1 %759 }
 0x145   : > { %v792_v36 = vpop.permute.xlu2 %791 }
 0x146   : > { %v743_v2 = vpop.f32.mrf.mxu3 }
 0x14c   : > { %v765_v14 = vpop.permute.xlu0 %764  ;;  %v755_v22 = vpop.permute.xlu1 %754 }
 0x14f   : > { %v746_v4 = vpop.f32.mrf.mxu3 }
 0x157   : > { %v749_v12 = vpop.f32.mrf.mxu3 }
 0x16d   : > { %v635_v59 = vpop.f32.mrf.mxu1 }
 0x16e   : > { %v653_v60 = vmul.f32 %v652_v58, %v635_v59 }
 0x170   : > { %694 = vmatpush.msrb.mxu1 %v653_v60  ;;  %993 = vmatpush.msra.mxu2 %v653_v60 }
 0x171   : > { %977 = vmatmul.msk.f32.vlgmr.msra.gmra.mxu2 %vm614_vm11, %v659_v61  ;;  %976 = vmatmul.msk.f32.vlgmr.msrb.gmra.mxu1 %vm614_vm11, %v658_v62 }
 0x172   : > { %980 = vmatpush.msk.msra.mxu1 %vm431_vm0, %v666_v25  ;;  %vm794_vm0 = vcmask 261120  }
 0x179   : > { %978 = vmatmul.msk.f32.gmra.mxu2 %vm614_vm11, %v660_v63  ;;  %981 = vmatmul.msk.f32.vlgmr.msra.gmra.mxu1 %vm427_vm1, %v654_v0  ;;  %vm826_vm1 = vcmask 130048  }
 0x181   : > { %979 = vmatmul.msk.f32.gmra.mxu2 %vm614_vm11, %v661_v1 }
 0x1ee   : > { %v696_v6 = vpop.f32.mrf.mxu1 }
 0x1f4   : > { %v699_v3 = vpop.f32.mrf.mxu2 }
 0x1f5   : > { %v744_v17 = vadd.f32 %v743_v2, %v699_v3 }
 0x1f6   : > { %v740_v15 = vpop.f32.mrf.mxu1 }
 0x1f7   : > { %v741_v20 = vadd.f32 %v740_v15, %v696_v6  ;;  %v773_v23 = vadd.f32 %v760_v9, %v744_v17 }
 0x1f9   : > { %v772_v27 = vadd.f32 %v755_v22, %v741_v20  ;;  %v777_v28 = vmax.f32 %v773_v23, 0.0 }
 0x1fb   : > { %v776_v29 = vmax.f32 %v772_v27, 0.0 }
 0x1fc   : > { %v702_v8 = vpop.f32.mrf.mxu2 }
 0x1fd   : > { %v747_v13 = vadd.f32 %v746_v4, %v702_v8 }
 0x1ff   : > { %v774_v19 = vadd.f32 %v765_v14, %v747_v13 }
 0x201   : > { %v778_v26 = vmax.f32 %v774_v19, 0.0 }
 0x204   : > { %v705_v16 = vpop.f32.mrf.mxu2 }
 0x205   : > { %v750_v18 = vadd.f32 %v749_v12, %v705_v16 }
 0x207   : > { %v775_v21 = vadd.f32 %v770_v5, %v750_v18 }
 0x209   : > { %v779_v24 = vmax.f32 %v775_v21, 0.0 }
 0x20b   : > { %813 = vmatpush.msrb.mxu0 %v779_v24 }
 0x20d   : > { %814 = vmatpush.msrb.mxu0 %v778_v26 }
 0x20f   : > { %815 = vmatpush.msrb.mxu0 %v777_v28 }
 0x211   : > { %816 = vmatpush.msrb.mxu0 %v776_v29 }
 0x212   : > { %985 = vmatmul.msk.f32.vlgmr.msrb.gmra.mxu0 %vm794_vm0, %v780_v30 }
 0x21a   : > { %986 = vmatmul.msk.f32.gmra.mxu0 %vm794_vm0, %v781_v31 }
 0x28f   : > { %v818_v33 = vpop.f32.mrf.mxu0 }
 0x290   : > { %v819_v34 = vadd.f32 %v818_v33, %v787_v32 }
 0x292   : > { %v824_v35 = vmax.f32 %v819_v34, 0.0 }
 0x294   : > { %827 = vst.msk [vmem:[%s392_s25] sm:$0xff] %vm826_vm1, %v824_v35 }
 0x297   : > { %v821_v37 = vpop.f32.mrf.mxu0 }
 0x298   : > { %v822_v38 = vadd.f32 %v821_v37, %v792_v36 }
 0x29a   : > { %v825_v39 = vmax.f32 %v822_v38, 0.0 }
 0x29c   : > { %828 = vst.msk [vmem:[%s392_s25 + $0x8] sm:$0xff] %vm826_vm1, %v825_v39 }
 0x29d   : > { %1092 = shalt.err (!%p1089_p5)
}
 0x29e   : > { %s1147_s29 = smov 128   ;;  %s1148_s25 = smov 8  }
 0x29f   : > { %995 = dma.vmem_to_hbm [thread:$0]  (%p1239_p4), %s844_s20, 256, %s846_s26, %s830_s27, %s1147_s29, %s1147_s29, %s1148_s25  }
 0x2a0 PF: > { %p1001_p6 = scmp.ge.s32.totalorder %s1143_s14, 2  ;;  %s860_s24 = sand.u32 1, %s1123_s30  }
 0x2a1   : > { %s861_s0 = scalar_lea.sflag [#allocation3], %s860_s24 }
 0x2a2   : > { %p998_p7 = pnand %p1001_p6, %p1246_p8 }
 0x2a4   : > { %p999_p9 = pneg %p998_p7 }
 0x2a6   : > { %1118 = dma.done.wait (%p999_p9), %s861_s0, 256  }
 0x2a7   : > { %1120 = vsyncadd (%p999_p9), %s861_s0, 4294967040  ;;  %s22_s14 = sadd.s32 1, %s1143_s14   ;;  %s1441_s30 = smov %s1127_s10 }
 0x2a8   : > { %p19_p10 = scmp.ge.s32.totalorder %s22_s14, 4   ;;  %s1442_s10 = smov %s1131_s11 }
 0x2a9   : > { %s1443_s11 = smov %s1252_s22  ;;  %s1444_s12 = smov %s1139_s13 }
 0x2aa   : > { %s1445_s13 = smov %s1447_s17  ;;  %21 = sbr.rel (!%p19_p10) target bundleno = 6 (0x6), region = 100 }
 0x2af   :  { %867 = vsyncpa [#allocation3], 1 }
 0x2b0   :  { %869 = vsyncpa [#allocation3 + $0x1], 1 }

</bundles_post_ra>
